<compile_context>
chip_gen: v7x
topology: tpu7x:2x2x1
jax: 0.10.0
libtpu: 0.0.40
codegen_flags: <defaults>
</compile_context>

<pallas_src>
import functools

import jax
import jax.numpy as jnp
from jax import lax
from jax.experimental import pallas as pl
from jax.experimental.pallas import tpu as pltpu


def _mha_kernel(x_ref, wqkv_ref, bqkv_ref, wo_ref, bo_ref, o_ref,
                *, num_head: int, head_dim: int):
    E = num_head * head_dim

    x = x_ref[...]                                            # [S, E]

    # One fused MXU matmul for every head's q/k/v (scale pre-folded into the
    # q columns/bias on the host).  f32 accumulation.
    qkv = jnp.dot(x, wqkv_ref[...],
                  preferred_element_type=jnp.float32) + bqkv_ref[...]  # [S, 3E]

    # Per-head attention cores, statically unrolled inside the single trace so
    # the compiler can interleave MXU / EUP / VPU work across heads.
    ctx_heads = []
    for h in range(num_head):
        lo = h * head_dim
        q = qkv[:, lo:lo + head_dim]                          # [S, Dh] (pre-scaled)
        k = qkv[:, E + lo:E + lo + head_dim]                  # [S, Dh]
        v = qkv[:, 2 * E + lo:2 * E + lo + head_dim]          # [S, Dh]

        # QK^T without an explicit transpose: contract last dims of both.
        s = lax.dot_general(q, k, (((1,), (1,)), ((), ())),
                            preferred_element_type=jnp.float32)   # [S, S]

        # Softmax in f32; denominator reciprocal on the EUP (approx) plus one
        # Newton step to stay within the 1e-4 tolerance.
        s = s - jnp.max(s, axis=-1, keepdims=True)
        p = jnp.exp(s)
        denom = jnp.sum(p, axis=-1, keepdims=True)
        r = pl.reciprocal(denom, approx=True)
        r = r * (2.0 - denom * r)
        p = p * r

        ctx_heads.append(jnp.dot(p, v, preferred_element_type=jnp.float32))

    # Concatenate head outputs along lanes -> one K=E out-projection matmul.
    ctx = jnp.concatenate(ctx_heads, axis=-1)                 # [S, E]
    out = jnp.dot(ctx, wo_ref[...],
                  preferred_element_type=jnp.float32) + bo_ref[...]
    o_ref[...] = out.astype(o_ref.dtype)


def pack_mha_weights(in_proj_weight, in_proj_bias, out_proj_weight,
                     out_proj_bias, *, num_head: int):
    """One-time host-side repack of the PyTorch-layout MHA parameters.

    Call this once and cache the result; re-deriving it every forward call
    costs as much as the kernel itself at these sizes.
    """
    three_e, E = in_proj_weight.shape
    assert three_e == 3 * E and E % num_head == 0
    Dh = E // num_head
    scale = 1.0 / (Dh ** 0.5)

    # Column scaling vector: q columns get the 1/sqrt(Dh) scale folded in.
    col_scale = jnp.concatenate(
        [jnp.full((E,), scale, jnp.float32), jnp.ones((2 * E,), jnp.float32)])

    wqkv = in_proj_weight.T * col_scale[None, :]              # [E, 3E]
    bqkv = (in_proj_bias * col_scale).reshape(1, 3 * E)       # [1, 3E]
    wo = out_proj_weight.T                                    # [E, E]
    bo = out_proj_bias.reshape(1, E)                          # [1, E]
    return wqkv, bqkv, wo, bo


def multi_head_attention_packed(x, wqkv, bqkv, wo, bo, *, num_head: int):
    """Pallas MHA forward on pre-packed weights (see pack_mha_weights)."""
    S, E = x.shape
    assert E % num_head == 0
    Dh = E // num_head

    kernel = functools.partial(_mha_kernel, num_head=num_head, head_dim=Dh)

    # Everything fits VMEM -> single kernel invocation, no grid, no pipelining.
    vmem = pl.BlockSpec(memory_space=pltpu.MemorySpace.VMEM)

    flops = (2 * S * E * (3 * E)                 # fused QKV projection
             + num_head * (2 * S * S * Dh) * 2   # QK^T + PV per head
             + 2 * S * E * E)                    # out projection
    bytes_accessed = 4 * (x.size + wqkv.size + bqkv.size + wo.size + bo.size
                          + S * E)
    cost = pl.CostEstimate(flops=flops,
                           transcendentals=num_head * S * S,
                           bytes_accessed=bytes_accessed)

    return pl.pallas_call(
        kernel,
        out_shape=jax.ShapeDtypeStruct((S, E), x.dtype),
        in_specs=[vmem, vmem, vmem, vmem, vmem],
        out_specs=vmem,
        cost_estimate=cost,
    )(x, wqkv, bqkv, wo, bo)


def multi_head_attention(x, in_proj_weight, in_proj_bias, out_proj_weight,
                         out_proj_bias, *, num_head: int):
    """Convenience wrapper: pack (unchached) + run.  Prefer caching the pack."""
    packed = pack_mha_weights(in_proj_weight, in_proj_bias, out_proj_weight,
                              out_proj_bias, num_head=num_head)
    return multi_head_attention_packed(x, *packed, num_head=num_head)


def _reference(x, in_proj_weight, in_proj_bias, out_proj_weight, out_proj_bias,
               *, num_head: int):
    """Pure-JAX reference mirroring the PyTorch forward exactly."""
    E = x.shape[-1]
    H = num_head
    Dh = E // H
    q = x @ in_proj_weight[:E].T + in_proj_bias[:E]
    k = x @ in_proj_weight[E:2 * E].T + in_proj_bias[E:2 * E]
    v = x @ in_proj_weight[2 * E:].T + in_proj_bias[2 * E:]
    q = jnp.transpose(q.reshape(-1, H, Dh), (1, 0, 2)) * (1.0 / Dh ** 0.5)
    k = jnp.transpose(k.reshape(-1, H, Dh), (1, 2, 0))
    v = jnp.transpose(v.reshape(-1, H, Dh), (1, 0, 2))
    dot = jnp.matmul(q, k)
    attn = jax.nn.softmax(dot, axis=-1)
    out = jnp.matmul(attn, v)
    out = jnp.transpose(out, (1, 0, 2)).reshape(-1, E)
    return out @ out_proj_weight.T + out_proj_bias


if __name__ == "__main__":
    S = 8          # sequence length
    E = 32         # embed_dim
    H = 4          # num_head

    key = jax.random.PRNGKey(0)
    kx, k1, k2, k3, k4 = jax.random.split(key, 5)

    x = jax.random.normal(kx, (S, E), dtype=jnp.float32)
    in_proj_weight = jax.random.normal(k1, (3 * E, E), dtype=jnp.float32) * 0.1
    in_proj_bias = jax.random.normal(k2, (3 * E,), dtype=jnp.float32) * 0.1
    out_proj_weight = jax.random.normal(k3, (E, E), dtype=jnp.float32) * 0.1
    out_proj_bias = jax.random.normal(k4, (E,), dtype=jnp.float32) * 0.1

    # Pack once (in real use: cache / store weights pre-packed), then run.
    packed = pack_mha_weights(in_proj_weight, in_proj_bias, out_proj_weight,
                              out_proj_bias, num_head=H)
    out = multi_head_attention_packed(x, *packed, num_head=H)
    out = jax.block_until_ready(out)

    ref = _reference(x, in_proj_weight, in_proj_bias,
                     out_proj_weight, out_proj_bias, num_head=H)
    assert out.shape == (S, E)
    assert jnp.allclose(out, ref, atol=1e-4, rtol=1e-4)

    print("KERNEL_OK")
</pallas_src>

<mosaic_0001>
module attributes {stable_mosaic.version = 11 : i64} {
  func.func @_mha_kernel(%arg0: memref<8x32xf32, #tpu.memory_space<vmem>>, %arg1: memref<32x96xf32, #tpu.memory_space<vmem>>, %arg2: memref<1x96xf32, #tpu.memory_space<vmem>>, %arg3: memref<32x32xf32, #tpu.memory_space<vmem>>, %arg4: memref<1x32xf32, #tpu.memory_space<vmem>>, %arg5: memref<8x32xf32, #tpu.memory_space<vmem>>) attributes {dimension_semantics = [], scalar_prefetch = 0 : i64, scratch_operands = 0 : i64, tpu.core_type = #tpu.core_type<tc>} {
    %c0 = arith.constant 0 : index
    %c0_0 = arith.constant 0 : index
    %0 = vector.load %arg0[%c0, %c0_0] : memref<8x32xf32, #tpu.memory_space<vmem>>, vector<8x32xf32>
    %c0_1 = arith.constant 0 : index
    %c0_2 = arith.constant 0 : index
    %1 = vector.load %arg1[%c0_1, %c0_2] : memref<32x96xf32, #tpu.memory_space<vmem>>, vector<32x96xf32>
    %cst = arith.constant dense<0.000000e+00> : vector<8x96xf32>
    %2 = tpu.matmul %0, %1, %cst {dimension_numbers = #tpu.dot_dimension_numbers<[1], [0], [0], [1], [0, 0, 1, 1], [], []>} : vector<8x32xf32>, vector<32x96xf32>, vector<8x96xf32> -> vector<8x96xf32>
    %c0_3 = arith.constant 0 : index
    %c0_4 = arith.constant 0 : index
    %3 = vector.load %arg2[%c0_3, %c0_4] : memref<1x96xf32, #tpu.memory_space<vmem>>, vector<1x96xf32>
    %4 = vector.broadcast %3 : vector<1x96xf32> to vector<8x96xf32>
    %5 = arith.addf %2, %4 : vector<8x96xf32>
    %6 = vector.extract_strided_slice %5 {offsets = [0, 0], sizes = [8, 8], strides = [1, 1]} : vector<8x96xf32> to vector<8x8xf32>
    %7 = vector.extract_strided_slice %5 {offsets = [0, 32], sizes = [8, 8], strides = [1, 1]} : vector<8x96xf32> to vector<8x8xf32>
    %8 = vector.extract_strided_slice %5 {offsets = [0, 64], sizes = [8, 8], strides = [1, 1]} : vector<8x96xf32> to vector<8x8xf32>
    %cst_5 = arith.constant dense<0.000000e+00> : vector<8x8xf32>
    %9 = tpu.matmul %6, %7, %cst_5 {dimension_numbers = #tpu.dot_dimension_numbers<[1], [1], [0], [0], [0, 0, 1, 0], [], []>} : vector<8x8xf32>, vector<8x8xf32>, vector<8x8xf32> -> vector<8x8xf32>
    %cst_6 = arith.constant dense<0xFF800000> : vector<8xf32>
    %10 = vector.multi_reduction <maximumf>, %9, %cst_6 [1] : vector<8x8xf32> to vector<8xf32>
    %11 = vector.shape_cast %10 : vector<8xf32> to vector<8x1xf32>
    %12 = vector.broadcast %11 : vector<8x1xf32> to vector<8x8xf32>
    %13 = arith.subf %9, %12 : vector<8x8xf32>
    %14 = math.exp %13 : vector<8x8xf32>
    %cst_7 = arith.constant dense<0.000000e+00> : vector<8xf32>
    %15 = vector.multi_reduction <add>, %14, %cst_7 [1] : vector<8x8xf32> to vector<8xf32>
    %16 = vector.shape_cast %15 : vector<8xf32> to vector<8x1xf32>
    %17 = tpu.reciprocal %16 {approx = true} : vector<8x1xf32> -> vector<8x1xf32>
    %18 = arith.mulf %16, %17 : vector<8x1xf32>
    %cst_8 = arith.constant 2.000000e+00 : f32
    %19 = vector.broadcast %cst_8 : f32 to vector<8x1xf32>
    %20 = arith.subf %19, %18 : vector<8x1xf32>
    %21 = arith.mulf %17, %20 : vector<8x1xf32>
    %22 = vector.broadcast %21 : vector<8x1xf32> to vector<8x8xf32>
    %23 = arith.mulf %14, %22 : vector<8x8xf32>
    %cst_9 = arith.constant dense<0.000000e+00> : vector<8x8xf32>
    %24 = tpu.matmul %23, %8, %cst_9 {dimension_numbers = #tpu.dot_dimension_numbers<[1], [0], [0], [1], [0, 0, 1, 1], [], []>} : vector<8x8xf32>, vector<8x8xf32>, vector<8x8xf32> -> vector<8x8xf32>
    %25 = vector.extract_strided_slice %5 {offsets = [0, 8], sizes = [8, 8], strides = [1, 1]} : vector<8x96xf32> to vector<8x8xf32>
    %26 = vector.extract_strided_slice %5 {offsets = [0, 40], sizes = [8, 8], strides = [1, 1]} : vector<8x96xf32> to vector<8x8xf32>
    %27 = vector.extract_strided_slice %5 {offsets = [0, 72], sizes = [8, 8], strides = [1, 1]} : vector<8x96xf32> to vector<8x8xf32>
    %cst_10 = arith.constant dense<0.000000e+00> : vector<8x8xf32>
    %28 = tpu.matmul %25, %26, %cst_10 {dimension_numbers = #tpu.dot_dimension_numbers<[1], [1], [0], [0], [0, 0, 1, 0], [], []>} : vector<8x8xf32>, vector<8x8xf32>, vector<8x8xf32> -> vector<8x8xf32>
    %cst_11 = arith.constant dense<0xFF800000> : vector<8xf32>
    %29 = vector.multi_reduction <maximumf>, %28, %cst_11 [1] : vector<8x8xf32> to vector<8xf32>
    %30 = vector.shape_cast %29 : vector<8xf32> to vector<8x1xf32>
    %31 = vector.broadcast %30 : vector<8x1xf32> to vector<8x8xf32>
    %32 = arith.subf %28, %31 : vector<8x8xf32>
    %33 = math.exp %32 : vector<8x8xf32>
    %cst_12 = arith.constant dense<0.000000e+00> : vector<8xf32>
    %34 = vector.multi_reduction <add>, %33, %cst_12 [1] : vector<8x8xf32> to vector<8xf32>
    %35 = vector.shape_cast %34 : vector<8xf32> to vector<8x1xf32>
    %36 = tpu.reciprocal %35 {approx = true} : vector<8x1xf32> -> vector<8x1xf32>
    %37 = arith.mulf %35, %36 : vector<8x1xf32>
    %cst_13 = arith.constant 2.000000e+00 : f32
    %38 = vector.broadcast %cst_13 : f32 to vector<8x1xf32>
    %39 = arith.subf %38, %37 : vector<8x1xf32>
    %40 = arith.mulf %36, %39 : vector<8x1xf32>
    %41 = vector.broadcast %40 : vector<8x1xf32> to vector<8x8xf32>
    %42 = arith.mulf %33, %41 : vector<8x8xf32>
    %cst_14 = arith.constant dense<0.000000e+00> : vector<8x8xf32>
    %43 = tpu.matmul %42, %27, %cst_14 {dimension_numbers = #tpu.dot_dimension_numbers<[1], [0], [0], [1], [0, 0, 1, 1], [], []>} : vector<8x8xf32>, vector<8x8xf32>, vector<8x8xf32> -> vector<8x8xf32>
    %44 = vector.extract_strided_slice %5 {offsets = [0, 16], sizes = [8, 8], strides = [1, 1]} : vector<8x96xf32> to vector<8x8xf32>
    %45 = vector.extract_strided_slice %5 {offsets = [0, 48], sizes = [8, 8], strides = [1, 1]} : vector<8x96xf32> to vector<8x8xf32>
    %46 = vector.extract_strided_slice %5 {offsets = [0, 80], sizes = [8, 8], strides = [1, 1]} : vector<8x96xf32> to vector<8x8xf32>
    %cst_15 = arith.constant dense<0.000000e+00> : vector<8x8xf32>
    %47 = tpu.matmul %44, %45, %cst_15 {dimension_numbers = #tpu.dot_dimension_numbers<[1], [1], [0], [0], [0, 0, 1, 0], [], []>} : vector<8x8xf32>, vector<8x8xf32>, vector<8x8xf32> -> vector<8x8xf32>
    %cst_16 = arith.constant dense<0xFF800000> : vector<8xf32>
    %48 = vector.multi_reduction <maximumf>, %47, %cst_16 [1] : vector<8x8xf32> to vector<8xf32>
    %49 = vector.shape_cast %48 : vector<8xf32> to vector<8x1xf32>
    %50 = vector.broadcast %49 : vector<8x1xf32> to vector<8x8xf32>
    %51 = arith.subf %47, %50 : vector<8x8xf32>
    %52 = math.exp %51 : vector<8x8xf32>
    %cst_17 = arith.constant dense<0.000000e+00> : vector<8xf32>
    %53 = vector.multi_reduction <add>, %52, %cst_17 [1] : vector<8x8xf32> to vector<8xf32>
    %54 = vector.shape_cast %53 : vector<8xf32> to vector<8x1xf32>
    %55 = tpu.reciprocal %54 {approx = true} : vector<8x1xf32> -> vector<8x1xf32>
    %56 = arith.mulf %54, %55 : vector<8x1xf32>
    %cst_18 = arith.constant 2.000000e+00 : f32
    %57 = vector.broadcast %cst_18 : f32 to vector<8x1xf32>
    %58 = arith.subf %57, %56 : vector<8x1xf32>
    %59 = arith.mulf %55, %58 : vector<8x1xf32>
    %60 = vector.broadcast %59 : vector<8x1xf32> to vector<8x8xf32>
    %61 = arith.mulf %52, %60 : vector<8x8xf32>
    %cst_19 = arith.constant dense<0.000000e+00> : vector<8x8xf32>
    %62 = tpu.matmul %61, %46, %cst_19 {dimension_numbers = #tpu.dot_dimension_numbers<[1], [0], [0], [1], [0, 0, 1, 1], [], []>} : vector<8x8xf32>, vector<8x8xf32>, vector<8x8xf32> -> vector<8x8xf32>
    %63 = vector.extract_strided_slice %5 {offsets = [0, 24], sizes = [8, 8], strides = [1, 1]} : vector<8x96xf32> to vector<8x8xf32>
    %64 = vector.extract_strided_slice %5 {offsets = [0, 56], sizes = [8, 8], strides = [1, 1]} : vector<8x96xf32> to vector<8x8xf32>
    %65 = vector.extract_strided_slice %5 {offsets = [0, 88], sizes = [8, 8], strides = [1, 1]} : vector<8x96xf32> to vector<8x8xf32>
    %cst_20 = arith.constant dense<0.000000e+00> : vector<8x8xf32>
    %66 = tpu.matmul %63, %64, %cst_20 {dimension_numbers = #tpu.dot_dimension_numbers<[1], [1], [0], [0], [0, 0, 1, 0], [], []>} : vector<8x8xf32>, vector<8x8xf32>, vector<8x8xf32> -> vector<8x8xf32>
    %cst_21 = arith.constant dense<0xFF800000> : vector<8xf32>
    %67 = vector.multi_reduction <maximumf>, %66, %cst_21 [1] : vector<8x8xf32> to vector<8xf32>
    %68 = vector.shape_cast %67 : vector<8xf32> to vector<8x1xf32>
    %69 = vector.broadcast %68 : vector<8x1xf32> to vector<8x8xf32>
    %70 = arith.subf %66, %69 : vector<8x8xf32>
    %71 = math.exp %70 : vector<8x8xf32>
    %cst_22 = arith.constant dense<0.000000e+00> : vector<8xf32>
    %72 = vector.multi_reduction <add>, %71, %cst_22 [1] : vector<8x8xf32> to vector<8xf32>
    %73 = vector.shape_cast %72 : vector<8xf32> to vector<8x1xf32>
    %74 = tpu.reciprocal %73 {approx = true} : vector<8x1xf32> -> vector<8x1xf32>
    %75 = arith.mulf %73, %74 : vector<8x1xf32>
    %cst_23 = arith.constant 2.000000e+00 : f32
    %76 = vector.broadcast %cst_23 : f32 to vector<8x1xf32>
    %77 = arith.subf %76, %75 : vector<8x1xf32>
    %78 = arith.mulf %74, %77 : vector<8x1xf32>
    %79 = vector.broadcast %78 : vector<8x1xf32> to vector<8x8xf32>
    %80 = arith.mulf %71, %79 : vector<8x8xf32>
    %cst_24 = arith.constant dense<0.000000e+00> : vector<8x8xf32>
    %81 = tpu.matmul %80, %65, %cst_24 {dimension_numbers = #tpu.dot_dimension_numbers<[1], [0], [0], [1], [0, 0, 1, 1], [], []>} : vector<8x8xf32>, vector<8x8xf32>, vector<8x8xf32> -> vector<8x8xf32>
    %82 = tpu.concatenate %24, %43, %62, %81 in 1 : vector<8x8xf32>, vector<8x8xf32>, vector<8x8xf32>, vector<8x8xf32> -> vector<8x32xf32>
    %c0_25 = arith.constant 0 : index
    %c0_26 = arith.constant 0 : index
    %83 = vector.load %arg3[%c0_25, %c0_26] : memref<32x32xf32, #tpu.memory_space<vmem>>, vector<32x32xf32>
    %cst_27 = arith.constant dense<0.000000e+00> : vector<8x32xf32>
    %84 = tpu.matmul %82, %83, %cst_27 {dimension_numbers = #tpu.dot_dimension_numbers<[1], [0], [0], [1], [0, 0, 1, 1], [], []>} : vector<8x32xf32>, vector<32x32xf32>, vector<8x32xf32> -> vector<8x32xf32>
    %c0_28 = arith.constant 0 : index
    %c0_29 = arith.constant 0 : index
    %85 = vector.load %arg4[%c0_28, %c0_29] : memref<1x32xf32, #tpu.memory_space<vmem>>, vector<1x32xf32>
    %86 = vector.broadcast %85 : vector<1x32xf32> to vector<8x32xf32>
    %87 = arith.addf %84, %86 : vector<8x32xf32>
    %c0_30 = arith.constant 0 : index
    %c0_31 = arith.constant 0 : index
    %88 = vector.load %arg5[%c0_30, %c0_31] : memref<8x32xf32, #tpu.memory_space<vmem>>, vector<8x32xf32>
    tpu.vector_store %arg5[%c0_30, %c0_31], %87 {strides = array<i32>} : memref<8x32xf32, #tpu.memory_space<vmem>>, vector<8x32xf32>,
    return
  }
}

</mosaic_0001>

<bundles_post_ra>
// kernel: tpu_custom_call.1
= control target key start
LH: loop header
LB: loop body
LE: loop exit
PB: predicated region body
PF: predicated region fallthrough
CT: control target
= control target key end

     0   :  { %10 = vsyncpa [#allocation3], 0  ;;  %s1370_s0 = inlined_call_operand.hbm [shape: f32[8,32], index: 0, kind: input, shape index: {}]   ;;  %s1371_s1 = inlined_call_operand.hbm [shape: f32[32,96], index: 1, kind: input, shape index: {}]   ;;  %s1372_s2 = inlined_call_operand.vmem [shape: f32[1,96], index: 2, kind: input, shape index: {}]   ;;  %s1373_s3 = inlined_call_operand.hbm [shape: f32[32,32], index: 3, kind: input, shape index: {}]   ;;  %s1374_s4 = inlined_call_operand.vmem [shape: f32[1,32], index: 4, kind: input, shape index: {}]   ;;  %s1375_s5 = inlined_call_operand.hbm [shape: f32[8,32], index: 5, kind: output, shape index: {}]  }
   0x1   :  { %11 = vsyncpa [#allocation6], 0 }
   0x2   :  { %12 = vsyncpa [#allocation4], 0  ;;  %s1184_s18 = smov [#allocation5]   ;;  %s1090_s22 = scalar_lea.hbm %s1371_s1, 512 }
   0x3   :  { %s28_s19 = sshll.u32 %s1184_s18, 4  ;;  %p1091_p0 = scmp.ne.s32.totalorder %s1371_s1, %s1090_s22  ;;  %s29_s19 = int_to_ptr.vmem [resolvable:$true] %s28_s19 }
   0x4   :  { %p1094_p1 = scmp.lt.u32.totalorder %s1090_s22, %s1371_s1 }
   0x6   :  { %p1096_p2 = pnand %p1094_p1, %p1091_p0 }
   0x8   :  { %1099 = shalt.err (!%p1096_p2)
}
   0x9   :  { %s1100_s27 = scalar_lea.vmem %s29_s19, 512  ;;  %p1105_p4 = scmp.lt.s32.totalorder %s29_s19, %s29_s19 }
   0xa   :  { %p1101_p3 = scmp.ne.s32.totalorder %s29_s19, %s1100_s27  ;;  %p1106_p5 = scmp.lt.s32.totalorder %s1100_s27, %s1100_s27 }
   0xc   :  { %p1107_p6 = por %p1106_p5, %p1105_p4 }
   0xe   :  { %p1108_p7 = pnand %p1107_p6, %p1101_p3 }
  0x10   :  { %1111 = shalt.err (!%p1108_p7)
}
  0x11   :  { %s1185_s28 = smov 128   ;;  %s1186_s29 = smov 8  }
  0x12   :  { %34 = dma.hbm_to_vmem [thread:$0]  %s1371_s1, 512, %s29_s19, [#allocation6], %s1185_s28, %s1185_s28, %s1186_s29  }
  0x13   :  { %s1187_s7 = smov [#allocation2]   ;;  %s1188_s9 = smov [#allocation7]  }
  0x14   :  { %s19_s8 = sshll.u32 %s1187_s7, 4  ;;  %s42_s10 = sshll.u32 %s1188_s9, 4  ;;  %s20_s8 = int_to_ptr.vmem [resolvable:$true] %s19_s8  ;;  %s43_s10 = int_to_ptr.vmem [resolvable:$true] %s42_s10 }
  0x15   :  { %s1112_s13 = scalar_lea.hbm %s1370_s0, 128 }
  0x16   :  { %p1113_p8 = scmp.ne.s32.totalorder %s1370_s0, %s1112_s13  ;;  %p1116_p9 = scmp.lt.u32.totalorder %s1112_s13, %s1370_s0 }
  0x18   :  { %p1118_p10 = pnand %p1116_p9, %p1113_p8 }
  0x1a   :  { %1121 = shalt.err (!%p1118_p10)
}
  0x1b   :  { %s1122_s1 = scalar_lea.vmem %s20_s8, 128  ;;  %p1127_p12 = scmp.lt.s32.totalorder %s20_s8, %s20_s8 }
  0x1c   :  { %p1123_p11 = scmp.ne.s32.totalorder %s20_s8, %s1122_s1  ;;  %p1128_p13 = scmp.lt.s32.totalorder %s1122_s1, %s1122_s1 }
  0x1e   :  { %p1129_p0 = por %p1128_p13, %p1127_p12 }
  0x20   :  { %p1130_p1 = pnand %p1129_p0, %p1123_p11 }
  0x22   :  { %1133 = shalt.err (!%p1130_p1)
}
  0x23   :  { %22 = dma.hbm_to_vmem [thread:$0]  %s1370_s0, 128, %s20_s8, [#allocation3]  }
  0x24   :  { %s1134_s22 = scalar_lea.hbm %s1373_s3, 512 }
  0x25   :  { %p1135_p2 = scmp.ne.s32.totalorder %s1373_s3, %s1134_s22  ;;  %p1138_p3 = scmp.lt.u32.totalorder %s1134_s22, %s1373_s3 }
  0x27   :  { %p1140_p4 = pnand %p1138_p3, %p1135_p2 }
  0x29   :  { %1143 = shalt.err (!%p1140_p4)
}
  0x2a   :  { %s1144_s27 = scalar_lea.vmem %s43_s10, 512  ;;  %p1149_p6 = scmp.lt.s32.totalorder %s43_s10, %s43_s10 }
  0x2b   :  { %p1145_p5 = scmp.ne.s32.totalorder %s43_s10, %s1144_s27  ;;  %p1150_p7 = scmp.lt.s32.totalorder %s1144_s27, %s1144_s27 }
  0x2d   :  { %p1151_p8 = por %p1150_p7, %p1149_p6 }
  0x2f   :  { %p1152_p9 = pnand %p1151_p8, %p1145_p5 }
  0x31   :  { %1155 = shalt.err (!%p1152_p9)
}
  0x32   :  { %48 = dma.hbm_to_vmem [thread:$0]  %s1373_s3, 512, %s43_s10, [#allocation6], %s1185_s28, %s1185_s28, %s1186_s29  }
  0x33   :  { %1178 = dma.done.wait [#allocation3], 128  }
  0x34   :  { %1179 = vsyncadd [#allocation3], 4294967168 }
  0x35   :  { %1180 = dma.done.wait [#allocation6], 1024  }
  0x36   :  { %1181 = vsyncadd [#allocation6], 4294966272  ;;  %v1189_v0 = vmov 0.0|0.0   ;;  %vm1190_vm0 = vmmov 0   ;;  %v1191_v1 = vmov 0.0   ;;  %v61_v2 = vld [vmem:[#allocation5] sm:$0xff] }
  0x37   :  { %1040 = vmatprep.subr.bf16.mxu0 %v1189_v0  ;;  %986 = vmatprep.mubr.msk.f32.mxu0 %vm1190_vm0, %v1191_v1  ;;  %v62_v3 = vld [vmem:[#allocation5 + $0x8] sm:$0xff]  ;;  %v63_v4 = vld [vmem:[#allocation5 + $0x10] sm:$0xff]  ;;  %v64_v6 = vld [vmem:[#allocation5 + $0x18] sm:$0xff]  ;;  %vm72_vm1 = vcmask 261120   ;;  %s1192_s6 = smov 64   ;;  %s1193_s7 = smov 96  }
  0x38   :  { %989 = vmatprep.subr.mxu1 %v1191_v1  ;;  %991 = vmatprep.mubr.msk.f32.mxu1 %vm1190_vm0, %v1191_v1  ;;  %v1041_v5 = vpack.c.bf16 %v62_v3, %v61_v2  ;;  %v1044_v7 = vpack.c.bf16 %v64_v6, %v63_v4  ;;  %v60_v8 = vld [vmem:[#allocation2] sm:$0xff]  ;;  %s1194_s8 = smov 88   ;;  %vm149_vm2 = vcmask 64512   ;;  %s1196_s9 = smov 120   ;;  %vm831_vm3 = vcmask 130048  }
  0x39   :  { %v936_v9 = vld [vmem:[%s1372_s2] ss:$0 sm:$0xff]  ;;  %s1195_s2 = smov 72   ;;  %s1197_s10 = smov 80   ;;  %vm833_vm4 = vcmask 195584  }
  0x3a   :  { %1042 = vmatpush3.bf16.msra.mxu0 %v1041_v5  ;;  %s1198_s11 = smov 112   ;;  %s1199_s12 = smov 104  }
  0x3b   :  { %1043 = vmatprep.subr.bf16.mxu0 %v1189_v0  ;;  %s1200_s13 = smov 56   ;;  %s1201_s14 = smov 40  }
  0x3c   :  { %s1202_s15 = smov 48   ;;  %s1203_s16 = smov 16  }
  0x3d   :  { %s1204_s17 = smov 24   ;;  %s1205_s18 = smov [#allocation8]  }
  0x3e   :  { %1045 = vmatpush3.bf16.msra.mxu0 %v1044_v7  ;;  %s926_s19 = sshll.u32 %s1205_s18, 4  ;;  %s927_s19 = int_to_ptr.vmem [resolvable:$true] %s926_s19 }
  0x3f   :  { %1009 = vmatprep.subr.mxu0 %v1191_v1  ;;  %s1156_s20 = scalar_lea.vmem %s927_s19, 128  ;;  %p1161_p11 = scmp.lt.s32.totalorder %s927_s19, %s927_s19 }
  0x40   :  { %p1157_p10 = scmp.ne.s32.totalorder %s927_s19, %s1156_s20  ;;  %p1162_p12 = scmp.lt.s32.totalorder %s1156_s20, %s1156_s20 }
  0x41   :  { %987 = vmatmul.mubr.msk.f32.vlgmr.msra.gmra.mrb[0].mxu0 %vm72_vm1, %v60_v8 }
  0x42   :  { %1011 = vmatprep.mubr.msk.f32.mxu0 %vm1190_vm0, %v1191_v1  ;;  %p1163_p13 = por %p1162_p12, %p1161_p11 }
  0x44   :  { %p1164_p0 = pnand %p1163_p13, %p1157_p10 }
 0x114   :  { %v142_v10 = vpop.f32.mrb[0].mxu0 }
 0x115   :  { %v1292_v11 = vadd.f32 %v936_v9, %v142_v10  ;;  %v988_v12 = vpop.f32.mrb[1].mxu0 }
 0x117   :  { %238 = vrot.lane.b32.xlu1 %v1292_v11, %s1192_s6  ;;  %147 = vrot.lane.b32.xlu0 %v1292_v11, %s1193_s7 }
 0x11b   :  { %316 = vrot.lane.b32.xlu1 %v1292_v11, %s1194_s8 }
 0x189   :  { %v148_v13 = vpop.permute.xlu0 %147  ;;  %v239_v14 = vpop.permute.xlu1 %238 }
 0x18a   :  { %990 = vmatpush3.xpose.msk.msra.mxu1 %vm149_vm2, %v148_v13 }
 0x18b   :  { %994 = vmatprep.subr.mxu1 %v1191_v1 }
 0x18d   :  { %992 = vmatmul.mubr.msk.f32.vlgmr.msra.gmra.mrb[0].mxu1 %vm149_vm2, %v1292_v11  ;;  %v317_v23 = vpop.permute.xlu1 %316 }
 0x18e   :  { %995 = vmatpush3.msra.mxu1 %v239_v14  ;;  %996 = vmatprep.mubr.msk.f32.mxu1 %vm1190_vm0, %v1191_v1 }
 0x18f   :  { %999 = vmatprep.subr.mxu1 %v1191_v1 }
 0x260   :  { %v220_v15 = vpop.f32.mrb[0].mxu1 }
 0x261   :  { %v993_v16 = vpop.f32.mrb[1].mxu1  ;;  %v224_v17 = vsel %vm149_vm2, %v220_v15, -inf }
 0x262   :  { %225 = vmax.xlane.f32.xlu0 %v224_v17 }
 0x278   :  { %652 = vrot.lane.b32.xlu0 %v1292_v11, %s1195_s2 }
 0x2ef   :  { %v226_v18 = vpop.xlane.xlu0 %225 }
 0x2f0   :  { %v227_v19 = vsub.f32 %v220_v15, %v226_v18 }
 0x2f2   :  { %v228_v20 = vmul.f32 1.442695, %v227_v19 }
 0x2f3   :  { %v653_v30 = vpop.permute.xlu0 %652 }
 0x2f4   :  { %1074 = vpow2.f32 %v228_v20  ;;  %v835_v20 = vld [vmem:[#allocation7] sm:$0xff] }
 0x2fe   :  { %v1075_v21 = vpop.eup %1074 }
 0x2ff   :  { %v230_v22 = vsel %vm149_vm2, %v1075_v21, 0.0 }
 0x300   :  { %231 = vadd.xlane.f32.xlu1 %v230_v22 }
 0x311   :  { %314 = vrot.lane.b32.xlu1 %v1292_v11, %s1196_s9 }
 0x315   :  { %484 = vrot.lane.b32.xlu1 %v1292_v11, %s1197_s10 }
 0x319   :  { %482 = vrot.lane.b32.xlu1 %v1292_v11, %s1198_s11 }
 0x31d   :  { %650 = vrot.lane.b32.xlu1 %v1292_v11, %s1199_s12 }
 0x38d   :  { %v232_v24 = vpop.xlane.xlu1 %231 }
 0x38e   :  { %1076 = vrcp.f32 %v232_v24 }
 0x391   :  { %v315_v25 = vpop.permute.xlu1 %314 }
 0x395   :  { %v485_v26 = vpop.permute.xlu1 %484 }
 0x396   :  { %1010 = vmatpush3.xpose.msk.msra.mxu0 %vm149_vm2, %v485_v26 }
 0x397   :  { %1019 = vmatprep.subr.mxu0 %v1191_v1 }
 0x398   :  { %v1077_v27 = vpop.eup %1076 }
 0x399   :  { %v234_v28 = vmul.f32 %v1077_v27, %v232_v24  ;;  %v483_v29 = vpop.permute.xlu1 %482  ;;  %v838_v24 = vld [vmem:[#allocation7 + $0x18] sm:$0xff] }
 0x39a   :  { %1012 = vmatmul.mubr.msk.f32.vlgmr.msra.gmra.mrb[2].mxu0 %vm149_vm2, %v483_v29 }
 0x39b   :  { %v235_v31 = vsub.f32 2.0, %v234_v28  ;;  %1020 = vmatpush3.xpose.msk.msra.mxu0 %vm149_vm2, %v653_v30  ;;  %1021 = vmatprep.mubr.msk.f32.mxu0 %vm1190_vm0, %v1191_v1 }
 0x39c   :  { %1046 = vmatprep.subr.bf16.mxu0 %v1189_v0 }
 0x39d   :  { %v236_v32 = vmul.f32 %v1077_v27, %v235_v31  ;;  %v651_v33 = vpop.permute.xlu1 %650 }
 0x39e   :  { %1022 = vmatmul.mubr.msk.f32.vlgmr.msra.gmra.mrb[4].mxu0 %vm149_vm2, %v651_v33 }
 0x39f   :  { %v237_v34 = vmul.f32 %v1075_v21, %v236_v32  ;;  %1037 = vmatprep.mubr.msk.f32.mxu0 %vm1190_vm0, %v1191_v1  ;;  %v836_v21 = vld [vmem:[#allocation7 + $0x8] sm:$0xff] }
 0x3a0   :  { %v1047_v22 = vpack.c.bf16 %v836_v21, %v835_v20 }
 0x3a1   :  { %997 = vmatmul.mubr.msk.f32.vlgmr.msra.gmra.mrb[2].mxu1 %vm149_vm2, %v237_v34 }
 0x3a2   :  { %1000 = vmatpush3.xpose.msk.msra.mxu1 %vm149_vm2, %v317_v23  ;;  %1001 = vmatprep.mubr.msk.f32.mxu1 %vm1190_vm0, %v1191_v1  ;;  %v837_v23 = vld [vmem:[#allocation7 + $0x10] sm:$0xff] }
 0x3a3   :  { %1004 = vmatprep.subr.mxu1 %v1191_v1  ;;  %1048 = vmatpush3.bf16.msra.mxu0 %v1047_v22 }
 0x3a4   :  { %1049 = vmatprep.subr.bf16.mxu0 %v1189_v0 }
 0x3a5   :  { %1002 = vmatmul.mubr.msk.f32.vlgmr.msra.gmra.mrb[4].mxu1 %vm149_vm2, %v315_v25  ;;  %v1050_v25 = vpack.c.bf16 %v838_v24, %v837_v23 }
 0x3a6   :  { %1006 = vmatprep.mubr.msk.f32.mxu1 %vm1190_vm0, %v1191_v1 }
 0x3a7   :  { %1051 = vmatpush3.bf16.msra.mxu0 %v1050_v25 }
 0x46d   :  { %v556_v35 = vpop.f32.mrb[2].mxu0 }
 0x46e   :  { %v1013_v36 = vpop.f32.mrb[3].mxu0  ;;  %v560_v37 = vsel %vm149_vm2, %v556_v35, -inf }
 0x46f   :  { %561 = vmax.xlane.f32.xlu0 %v560_v37  ;;  %v950_v36 = vld [vmem:[%s1374_s4] ss:$0 sm:$0xff] }
 0x471   :  { %v724_v38 = vpop.f32.mrb[4].mxu0 }
 0x472   :  { %v1023_v39 = vpop.f32.mrb[5].mxu0  ;;  %v728_v45 = vsel %vm149_vm2, %v724_v38, -inf }
 0x474   :  { %v1330_v40 = vpop.f32.mrb[2].mxu1 }
 0x475   :  { %v998_v41 = vpop.f32.mrb[3].mxu1 }
 0x478   :  { %v388_v42 = vpop.f32.mrb[4].mxu1 }
 0x479   :  { %v1003_v43 = vpop.f32.mrb[5].mxu1  ;;  %v392_v44 = vsel %vm149_vm2, %v388_v42, -inf }
 0x47a   :  { %393 = vmax.xlane.f32.xlu1 %v392_v44 }
 0x47e   :  { %729 = vmax.xlane.f32.xlu1 %v728_v45 }
 0x4fc   :  { %v562_v46 = vpop.xlane.xlu0 %561 }
 0x4fd   :  { %v563_v47 = vsub.f32 %v556_v35, %v562_v46 }
 0x4ff   :  { %v564_v48 = vmul.f32 1.442695, %v563_v47 }
 0x501   :  { %1078 = vpow2.f32 %v564_v48 }
 0x507   :  { %v394_v49 = vpop.xlane.xlu1 %393 }
 0x508   :  { %v395_v50 = vsub.f32 %v388_v42, %v394_v49 }
 0x50a   :  { %v396_v51 = vmul.f32 1.442695, %v395_v50 }
 0x50b   :  { %v1079_v52 = vpop.eup %1078  ;;  %v730_v53 = vpop.xlane.xlu1 %729 }
 0x50c   :  { %1080 = vpow2.f32 %v396_v51  ;;  %v731_v54 = vsub.f32 %v724_v38, %v730_v53  ;;  %v566_v55 = vsel %vm149_vm2, %v1079_v52, 0.0 }
 0x50d   :  { %567 = vadd.xlane.f32.xlu1 %v566_v55 }
 0x50e   :  { %v732_v56 = vmul.f32 1.442695, %v731_v54 }
 0x510   :  { %1082 = vpow2.f32 %v732_v56 }
 0x516   :  { %v1081_v57 = vpop.eup %1080 }
 0x517   :  { %v398_v58 = vsel %vm149_vm2, %v1081_v57, 0.0 }
 0x518   :  { %399 = vadd.xlane.f32.xlu1 %v398_v58 }
 0x51a   :  { %v1083_v59 = vpop.eup %1082 }
 0x51b   :  { %v734_v60 = vsel %vm149_vm2, %v1083_v59, 0.0 }
 0x51c   :  { %735 = vadd.xlane.f32.xlu0 %v734_v60 }
 0x529   :  { %406 = vrot.lane.b32.xlu1 %v1292_v11, %s1200_s13 }
 0x52d   :  { %742 = vrot.lane.b32.xlu1 %v1292_v11, %s1201_s14 }
 0x532   :  { %574 = vrot.lane.b32.xlu0 %v1292_v11, %s1202_s15 }
 0x59a   :  { %v568_v61 = vpop.xlane.xlu1 %567 }
 0x59b   :  { %1084 = vrcp.f32 %v568_v61 }
 0x5a5   :  { %v400_v62 = vpop.xlane.xlu1 %399  ;;  %v1085_v3 = vpop.eup %1084 }
 0x5a6   :  { %1086 = vrcp.f32 %v400_v62  ;;  %v570_v4 = vmul.f32 %v1085_v3, %v568_v61 }
 0x5a8   :  { %v571_v7 = vsub.f32 2.0, %v570_v4 }
 0x5a9   :  { %v736_v63 = vpop.xlane.xlu0 %735  ;;  %v407_v2 = vpop.permute.xlu1 %406 }
 0x5aa   :  { %1088 = vrcp.f32 %v736_v63  ;;  %1005 = vmatpush3.msra.mxu1 %v407_v2  ;;  %v572_v11 = vmul.f32 %v1085_v3, %v571_v7 }
 0x5ab   :  { %1014 = vmatprep.subr.mxu1 %v1191_v1 }
 0x5ac   :  { %v573_v16 = vmul.f32 %v1079_v52, %v572_v11 }
 0x5ad   :  { %v575_v15 = vpop.permute.xlu0 %574  ;;  %v743_v18 = vpop.permute.xlu1 %742 }
 0x5b0   :  { %v1087_v5 = vpop.eup %1086 }
 0x5b1   :  { %v402_v6 = vmul.f32 %v1087_v5, %v400_v62 }
 0x5b3   :  { %v403_v8 = vsub.f32 2.0, %v402_v6 }
 0x5b4   :  { %v1089_v9 = vpop.eup %1088 }
 0x5b5   :  { %v404_v10 = vmul.f32 %v1087_v5, %v403_v8  ;;  %v738_v12 = vmul.f32 %v1089_v9, %v736_v63 }
 0x5b7   :  { %v405_v13 = vmul.f32 %v1081_v57, %v404_v10  ;;  %v739_v14 = vsub.f32 2.0, %v738_v12 }
 0x5b9   :  { %1007 = vmatmul.mubr.msk.f32.vlgmr.msra.gmra.mrb[6].mxu1 %vm149_vm2, %v405_v13  ;;  %v740_v17 = vmul.f32 %v1089_v9, %v739_v14 }
 0x5ba   :  { %1015 = vmatpush3.msra.mxu1 %v575_v15  ;;  %1016 = vmatprep.mubr.msk.f32.mxu1 %vm1190_vm0, %v1191_v1 }
 0x5bb   :  { %1024 = vmatprep.subr.mxu1 %v1191_v1  ;;  %v741_v19 = vmul.f32 %v1083_v59, %v740_v17 }
 0x5bd   :  { %1017 = vmatmul.mubr.msk.f32.vlgmr.msra.gmra.mrb[8].mxu1 %vm149_vm2, %v573_v16 }
 0x5be   :  { %1025 = vmatpush3.msra.mxu1 %v743_v18  ;;  %1026 = vmatprep.mubr.msk.f32.mxu1 %vm1190_vm0, %v1191_v1 }
 0x5c1   :  { %1027 = vmatmul.mubr.msk.f32.vlgmr.msra.gmra.mrb[10].mxu1 %vm149_vm2, %v741_v19 }
 0x68c   :  { %v478_v26 = vpop.f32.mrb[6].mxu1 }
 0x68d   :  { %819 = vrot.lane.b32.xlu1 %v478_v26, %s1186_s29  ;;  %v1008_v27 = vpop.f32.mrb[7].mxu1 }
 0x690   :  { %v646_v28 = vpop.f32.mrb[8].mxu1 }
 0x691   :  { %823 = vrot.lane.b32.xlu0 %v646_v28, %s1203_s16  ;;  %v1018_v1 = vpop.f32.mrb[9].mxu1 }
 0x694   :  { %v814_v29 = vpop.f32.mrb[10].mxu1 }
 0x695   :  { %827 = vrot.lane.b32.xlu1 %v814_v29, %s1204_s17  ;;  %v1028_v30 = vpop.f32.mrb[11].mxu1 }
 0x6ff   :  { %v820_v31 = vpop.permute.xlu1 %819 }
 0x700   :  { %v830_v0 = vsel %vm149_vm2, %v1330_v40, %v820_v31 }
 0x703   :  { %v824_v32 = vpop.permute.xlu0 %823 }
 0x704   :  { %v832_v33 = vsel %vm831_vm3, %v830_v0, %v824_v32 }
 0x707   :  { %v828_v34 = vpop.permute.xlu1 %827 }
 0x708   :  { %v834_v35 = vsel %vm833_vm4, %v832_v33, %v828_v34 }
 0x709   :  { %1038 = vmatmul.mubr.msk.f32.vlgmr.msra.gmra.mrb[6].mxu0 %vm72_vm1, %v834_v35 }
 0x7dc   :  { %v915_v37 = vpop.f32.mrb[6].mxu0 }
 0x7dd   :  { %v916_v38 = vadd.f32 %v950_v36, %v915_v37  ;;  %v1039_v39 = vpop.f32.mrb[7].mxu0 }
 0x7df   :  { %919 = vst.msk [vmem:[#allocation8] sm:$0xff] %vm72_vm1, %v916_v38 }
 0x7e0   :  { %1167 = shalt.err (!%p1164_p0)
}
 0x7e1   :  { %s1168_s23 = scalar_lea.hbm %s1375_s5, 128 }
 0x7e2   :  { %p1169_p1 = scmp.ne.s32.totalorder %s1375_s5, %s1168_s23  ;;  %p1172_p2 = scmp.lt.u32.totalorder %s1168_s23, %s1375_s5 }
 0x7e4   :  { %p1174_p3 = pnand %p1172_p2, %p1169_p1 }
 0x7e6   :  { %1177 = shalt.err (!%p1174_p3)
}
 0x7e7   :  { %929 = dma.vmem_to_hbm [thread:$0]  %s927_s19, 128, %s1375_s5, [#allocation4]  }
 0x7e8   :  { %1182 = dma.done.wait [#allocation4], 128  }
 0x7e9   :  { %1183 = vsyncadd [#allocation4], 4294967168 }
 0x7ea   :  { %933 = vsyncpa [#allocation3], 1 }
 0x7eb   :  { %934 = vsyncpa [#allocation6], 1 }
 0x7ec   :  { %935 = vsyncpa [#allocation4], 1 }

</bundles_post_ra>
